<compile_context>
chip_gen: v5e
topology: v5e:2x2
jax: 0.10.0
libtpu: 0.0.40
codegen_flags: <defaults>
</compile_context>

<pallas_src>
import math

import jax
import jax.numpy as jnp
from jax.experimental import pallas as pl
from jax.experimental.pallas import tpu as pltpu

_LANE = 128
_IN_BLOCK_BYTES = 8 * 1024 * 1024       # padded per-buffer input-tile budget (x2 double buffering)
_VMEM_LIMIT_BYTES = 48 * 1024 * 1024    # fits v7x (64 MiB phys) with headroom; raise over 32 MiB for v5e/v6e
_PALLAS_MIN_ELEMENTS = 1 << 20          # below ~1M elements a fused jnp.sum beats a standalone pallas_call


def _round_up(x: int, m: int) -> int:
    return (x + m - 1) // m * m


def _vdn_kernel(q_ref, o_ref):
    """q_ref: (block_pre, n, block_post); o_ref: (block_pre, block_post).

    The whole agent-axis reduction is in-block (n is small and static), accumulated
    in f32; consequently both grid axes are embarrassingly parallel and the kernel
    is pure HBM streaming.
    """
    q = q_ref[...].astype(jnp.float32)
    o_ref[...] = jnp.sum(q, axis=1).astype(o_ref.dtype)


def _choose_blocks(pre: int, n: int, post: int, itemsize: int):
    """Pick (block_pre, block_post) so the *padded* VMEM tile stays within budget,
    tile dims satisfy the TPU (sublane, lane) rules, and the parallel grid has
    >= 2 steps whenever the data is splittable (v7x megacore)."""
    sub = max(8, 32 // itemsize)             # dtype-native sublane multiple: 8 f32, 16 bf16, 32 int8/fp8
    n_pad = _round_up(n, sub)                # agent axis pads to sublane granularity in VMEM
    budget = _IN_BLOCK_BYTES // itemsize     # padded elements per input buffer

    # Lane (feature) axis: take the full extent if it fits, else a multiple of 128.
    if post <= _LANE:
        block_post = post
    else:
        max_post_pad = max(_LANE, (budget // (sub * n_pad)) // _LANE * _LANE)
        block_post = post if _round_up(post, _LANE) <= max_post_pad else max_post_pad
    block_post_pad = _round_up(block_post, _LANE)

    # Sublane (batch) axis: full extent if it fits, else a multiple of `sub`.
    max_pre = max(sub, (budget // (n_pad * block_post_pad)) // sub * sub)
    block_pre = pre if pre <= max_pre else max_pre

    # v7x megacore: never let the parallel grid collapse to a single step if we can split.
    if pl.cdiv(pre, block_pre) * pl.cdiv(post, block_post) == 1:
        if pre >= 2 * sub:
            block_pre = _round_up(pl.cdiv(pre, 2), sub)
        elif post >= 2 * _LANE:
            block_post = _round_up(pl.cdiv(post, 2), _LANE)

    return block_pre, block_post


def _vdn_forward_pallas(q_values: jax.Array) -> jax.Array:
    shape = q_values.shape
    assert len(shape) >= 2, "q_values must have at least 2 dims (dim=1 is reduced)"
    pre, n = shape[0], shape[1]
    post = int(math.prod(shape[2:])) if len(shape) > 2 else 1

    # Free reshape only -- no transpose, no pad, no extra HBM traffic.
    q3 = q_values.reshape(pre, n, post)
    itemsize = jnp.dtype(q_values.dtype).itemsize
    block_pre, block_post = _choose_blocks(pre, n, post, itemsize)
    grid = (pl.cdiv(pre, block_pre), pl.cdiv(post, block_post))

    cost = pl.CostEstimate(
        flops=max(n - 1, 0) * pre * post,
        transcendentals=0,
        bytes_accessed=(pre * n * post + pre * post) * itemsize,
    )

    out2 = pl.pallas_call(
        _vdn_kernel,
        out_shape=jax.ShapeDtypeStruct((pre, post), q_values.dtype),
        grid=grid,
        in_specs=[pl.BlockSpec((block_pre, n, block_post), lambda i, j: (i, 0, j))],
        out_specs=pl.BlockSpec((block_pre, block_post), lambda i, j: (i, j)),
        compiler_params=pltpu.CompilerParams(
            dimension_semantics=("parallel", "parallel"),
            vmem_limit_bytes=_VMEM_LIMIT_BYTES,
        ),
        cost_estimate=cost,
    )(q3)

    # Restore the PyTorch output shape (pre, 1, *rest) -- a free reshape.
    return out2.reshape((pre, 1) + tuple(shape[2:]))


def vdn_forward(q_values: jax.Array, *, use_pallas=None) -> jax.Array:
    """vdn_network.forward: sum over dim=1 with keepdim.

    Default dispatch: use the Pallas kernel only when the op is big enough to be
    HBM-bound AND lane-dense (trailing width >= 128); otherwise let XLA fuse a
    plain sum (canonical small (B, N, 1) VDN inputs fall in this bucket).
    """
    if use_pallas is None:
        post = int(math.prod(q_values.shape[2:])) if q_values.ndim > 2 else 1
        use_pallas = (q_values.size >= _PALLAS_MIN_ELEMENTS) and (post >= _LANE)
    if use_pallas:
        return _vdn_forward_pallas(q_values)
    return jnp.sum(q_values, axis=1, keepdims=True)


if __name__ == "__main__":
    # vdn_network has no parameters, only the q_values input.
    key = jax.random.PRNGKey(0)
    k1, k2, k3 = jax.random.split(key, 3)

    # 1) Canonical VDN shape (batch, n_agents, 1) -- force the Pallas path to
    #    exercise the kernel even though the auto-dispatch would use jnp.sum.
    q_small = jax.random.normal(k1, (8, 4, 1), dtype=jnp.float32)
    out_small = jax.block_until_ready(vdn_forward(q_small, use_pallas=True))
    ref_small = jnp.sum(q_small, axis=1, keepdims=True)
    assert out_small.shape == ref_small.shape == (8, 1, 1)
    assert jnp.allclose(out_small, ref_small, atol=1e-6, rtol=1e-6)

    # 2) Lane-dense trailing feature dim: main tiled path, 2 parallel grid steps.
    q_big = jax.random.normal(k2, (64, 5, 256), dtype=jnp.float32)
    out_big = jax.block_until_ready(vdn_forward(q_big, use_pallas=True))
    ref_big = jnp.sum(q_big, axis=1, keepdims=True)
    assert out_big.shape == ref_big.shape == (64, 1, 256)
    assert jnp.allclose(out_big, ref_big, atol=1e-5, rtol=1e-5)

    # 3) bf16 input: kernel accumulates in f32, outputs bf16 (matches torch dtype).
    q_bf16 = jax.random.normal(k3, (32, 6, 384), dtype=jnp.float32).astype(jnp.bfloat16)
    out_bf16 = jax.block_until_ready(vdn_forward(q_bf16, use_pallas=True))
    ref_bf16 = jnp.sum(q_bf16.astype(jnp.float32), axis=1, keepdims=True)
    assert out_bf16.shape == (32, 1, 384)
    assert jnp.allclose(out_bf16.astype(jnp.float32), ref_bf16, atol=2e-2, rtol=2e-2)

    # 4) Default dispatch on a tiny input takes the fused jnp.sum path.
    out_auto = jax.block_until_ready(vdn_forward(q_small))
    assert jnp.allclose(out_auto, ref_small, atol=1e-6, rtol=1e-6)

    print("KERNEL_OK")
</pallas_src>

<mosaic_0001>
module attributes {stable_mosaic.version = 11 : i64} {
  func.func @_vdn_kernel(%arg0: i32, %arg1: i32, %arg2: memref<8x4x1xf32, #tpu.memory_space<vmem>>, %arg3: memref<8x1xf32, #tpu.memory_space<vmem>>) attributes {dimension_semantics = [#tpu.dimension_semantics<parallel>, #tpu.dimension_semantics<parallel>], iteration_bounds = array<i64: 1, 1>, scalar_prefetch = 0 : i64, scratch_operands = 0 : i64, tpu.core_type = #tpu.core_type<tc>, window_params = [{transform_indices = @transform_0, window_bounds = array<i64: 8, 4, 1>}, {transform_indices = @transform_1, window_bounds = array<i64: 8, 1>}]} {
    %c0 = arith.constant 0 : index
    %c0_0 = arith.constant 0 : index
    %c0_1 = arith.constant 0 : index
    %0 = vector.load %arg2[%c0, %c0_0, %c0_1] : memref<8x4x1xf32, #tpu.memory_space<vmem>>, vector<8x4x1xf32>
    %cst = arith.constant dense<0.000000e+00> : vector<8x1xf32>
    %1 = vector.multi_reduction <add>, %0, %cst [1] : vector<8x4x1xf32> to vector<8x1xf32>
    %c0_2 = arith.constant 0 : index
    %c0_3 = arith.constant 0 : index
    %2 = vector.load %arg3[%c0_2, %c0_3] : memref<8x1xf32, #tpu.memory_space<vmem>>, vector<8x1xf32>
    tpu.vector_store %arg3[%c0_2, %c0_3], %1 {strides = array<i32>} : memref<8x1xf32, #tpu.memory_space<vmem>>, vector<8x1xf32>,
    return
  }
  func.func @transform_0(%arg0: i32, %arg1: i32) -> (i32, i32, i32) {
    %c0_i32 = arith.constant 0 : i32
    %c0_i32_0 = arith.constant 0 : i32
    return %arg0, %c0_i32, %arg1 : i32, i32, i32
  }
  func.func @transform_1(%arg0: i32, %arg1: i32) -> (i32, i32) {
    %c0_i32 = arith.constant 0 : i32
    return %arg0, %arg1 : i32, i32
  }
}

</mosaic_0001>

<bundles_post_ra>
// kernel: tpu_custom_call.1
= control target key start
LH: loop header
LB: loop body
LE: loop exit
PB: predicated region body
PF: predicated region fallthrough
CT: control target
= control target key end

     0   :  { %vm16_vm0 = vcmask 3072   ;;  %vm81_vm1 = vcmask 1041409   ;;  %vm83_vm2 = vcmask 1042434   ;;  %vm85_vm3 = vcmask 1043459   ;;  %s150_s0 = inlined_call_operand.vmem [shape: f32[8,4,1], index: 0, kind: input, shape index: {}]   ;;  %s151_s1 = inlined_call_operand.vmem [shape: f32[8,1], index: 1, kind: output, shape index: {}]  }
   0x1   :  { %v8_v0 = vld [vmem:[%s150_s0] sm:$0xf]  ;;  %v9_v1 = vld [vmem:[%s150_s0 + $0x4] sm:$0xf]  ;;  %v10_v2 = vld [vmem:[%s150_s0 + $0x8] sm:$0xf] }
   0x2   :  { %v11_v3 = vld [vmem:[%s150_s0 + $0xc] sm:$0xf]  ;;  %v12_v4 = vld [vmem:[%s150_s0 + $0x10] sm:$0xf]  ;;  %v13_v5 = vld [vmem:[%s150_s0 + $0x14] sm:$0xf] }
   0x3   :  { %v14_v6 = vld [vmem:[%s150_s0 + $0x18] sm:$0xf]  ;;  %v17_v7 = vsel %vm16_vm0, %v8_v0, 0.0  ;;  %v24_v8 = vsel %vm16_vm0, %v9_v1, 0.0  ;;  %v15_v9 = vld [vmem:[%s150_s0 + $0x1c] sm:$0xf] }
   0x4   :  { %v18_v10 = vrot.slane %v17_v7, 4  ;;  %v25_v11 = vrot.slane %v24_v8, 4  ;;  %v31_v12 = vsel %vm16_vm0, %v10_v2, 0.0  ;;  %v38_v13 = vsel %vm16_vm0, %v11_v3, 0.0 }
   0x5   :  { %v32_v14 = vrot.slane %v31_v12, 4  ;;  %v39_v15 = vrot.slane %v38_v13, 4  ;;  %v45_v16 = vsel %vm16_vm0, %v12_v4, 0.0  ;;  %v52_v17 = vsel %vm16_vm0, %v13_v5, 0.0 }
   0x6   :  { %v19_v18 = vadd.f32 %v18_v10, %v17_v7  ;;  %v26_v19 = vadd.f32 %v25_v11, %v24_v8  ;;  %v46_v20 = vrot.slane %v45_v16, 4  ;;  %v53_v21 = vrot.slane %v52_v17, 4 }
   0x7   :  { %v33_v22 = vadd.f32 %v32_v14, %v31_v12  ;;  %v40_v23 = vadd.f32 %v39_v15, %v38_v13  ;;  %v59_v24 = vsel %vm16_vm0, %v14_v6, 0.0  ;;  %v66_v25 = vsel %vm16_vm0, %v15_v9, 0.0 }
   0x8   :  { %v20_v26 = vrot.slane %v19_v18, 2  ;;  %v27_v27 = vrot.slane %v26_v19, 2  ;;  %v47_v28 = vadd.f32 %v46_v20, %v45_v16  ;;  %v54_v29 = vadd.f32 %v53_v21, %v52_v17 }
   0x9   :  { %v34_v30 = vrot.slane %v33_v22, 2  ;;  %v41_v31 = vrot.slane %v40_v23, 2  ;;  %v60_v32 = vrot.slane %v59_v24, 4  ;;  %v67_v33 = vrot.slane %v66_v25, 4 }
   0xa   :  { %v21_v34 = vadd.f32 %v20_v26, %v19_v18  ;;  %v28_v35 = vadd.f32 %v27_v27, %v26_v19  ;;  %v48_v36 = vrot.slane %v47_v28, 2  ;;  %v55_v37 = vrot.slane %v54_v29, 2 }
   0xb   :  { %v35_v38 = vadd.f32 %v34_v30, %v33_v22  ;;  %v42_v39 = vadd.f32 %v41_v31, %v40_v23  ;;  %v61_v40 = vadd.f32 %v60_v32, %v59_v24  ;;  %v68_v41 = vadd.f32 %v67_v33, %v66_v25 }
   0xc   :  { %v22_v42 = vrot.slane %v21_v34, 1  ;;  %v29_v43 = vrot.slane %v28_v35, 1  ;;  %v49_v44 = vadd.f32 %v48_v36, %v47_v28  ;;  %v56_v45 = vadd.f32 %v55_v37, %v54_v29 }
   0xd   :  { %v36_v46 = vrot.slane %v35_v38, 1  ;;  %v43_v47 = vrot.slane %v42_v39, 1  ;;  %v62_v48 = vrot.slane %v61_v40, 2  ;;  %v69_v49 = vrot.slane %v68_v41, 2 }
   0xe   :  { %v23_v50 = vadd.f32 %v22_v42, %v21_v34  ;;  %v30_v51 = vadd.f32 %v29_v43, %v28_v35  ;;  %v50_v52 = vrot.slane %v49_v44, 1  ;;  %v57_v53 = vrot.slane %v56_v45, 1 }
   0xf   :  { %v37_v54 = vadd.f32 %v36_v46, %v35_v38  ;;  %v44_v55 = vadd.f32 %v43_v47, %v42_v39  ;;  %v63_v56 = vadd.f32 %v62_v48, %v61_v40  ;;  %v70_v57 = vadd.f32 %v69_v49, %v68_v41 }
  0x10   :  { %v51_v58 = vadd.f32 %v50_v52, %v49_v44  ;;  %v58_v59 = vadd.f32 %v57_v53, %v56_v45  ;;  %v82_v60 = vsel %vm81_vm1, %v30_v51, %v23_v50  ;;  %vm87_vm4 = vcmask 1044484  }
  0x11   :  { %v64_v61 = vrot.slane %v63_v56, 1  ;;  %v71_v62 = vrot.slane %v70_v57, 1  ;;  %v84_v63 = vsel %vm83_vm2, %v37_v54, %v82_v60  ;;  %vm89_vm5 = vcmask 1045509  }
  0x12   :  { %v86_v0 = vsel %vm85_vm3, %v44_v55, %v84_v63  ;;  %vm91_vm6 = vcmask 1046534   ;;  %vm93_vm7 = vcmask 1047559   ;;  %vm96_vm8 = vcmask 7168  }
  0x13   :  { %v65_v1 = vadd.f32 %v64_v61, %v63_v56  ;;  %v72_v2 = vadd.f32 %v71_v62, %v70_v57  ;;  %v88_v3 = vsel %vm87_vm4, %v51_v58, %v86_v0 }
  0x14   :  { %v90_v4 = vsel %vm89_vm5, %v58_v59, %v88_v3 }
  0x15   :  { %v92_v5 = vsel %vm91_vm6, %v65_v1, %v90_v4 }
  0x16   :  { %v94_v6 = vsel %vm93_vm7, %v72_v2, %v92_v5 }
  0x17   :  { %97 = vst.msk [vmem:[%s151_s1] sm:$0xff] %vm96_vm8, %v94_v6 }

</bundles_post_ra>
